<compile_context>
chip_gen: v5e
topology: v5e:2x2
jax: 0.10.0
libtpu: 0.0.40
codegen_flags: <defaults>
</compile_context>

<pallas_src>
import numpy as np
import jax
import jax.numpy as jnp
from jax.experimental import pallas as pl
from jax.experimental.pallas import tpu as pltpu


# ---------------------------------------------------------------------------
# Host-side helper: 1-D bilinear-interpolation matrix
# (align_corners=False, same convention as torch F.interpolate / kornia).
# Returns (n_out, n_in):  out = M @ in.
# ---------------------------------------------------------------------------
def bilinear_matrix(n_in: int, n_out: int) -> np.ndarray:
    scale = n_in / n_out
    dst = np.arange(n_out, dtype=np.float64)
    src = (dst + 0.5) * scale - 0.5
    src = np.clip(src, 0.0, n_in - 1)
    lo = np.floor(src).astype(np.int64)
    hi = np.minimum(lo + 1, n_in - 1)
    w_hi = (src - lo).astype(np.float32)
    w_lo = (1.0 - w_hi).astype(np.float32)
    m = np.zeros((n_out, n_in), dtype=np.float32)
    m[np.arange(n_out), lo] += w_lo
    m[np.arange(n_out), hi] += w_hi
    return m


# ---------------------------------------------------------------------------
# Pallas kernel: one block of TILE_BC flattened (batch, channel) slabs.
#   resize:    y = x_block @ K            (single lane-dense MXU matmul)
#   normalize: o = y * scale + bias       (broadcast FMA along the lane dim)
# ---------------------------------------------------------------------------
def resize_normalize_kernel(kmat_ref, scale_ref, bias_ref, x_ref, o_ref):
    y = jnp.dot(x_ref[...], kmat_ref[...],
                preferred_element_type=jnp.float32)        # (tile_bc, HW_out)
    o_ref[...] = y * scale_ref[...] + bias_ref[...]        # (tile_bc,1) bcast


# ---------------------------------------------------------------------------
# Generation-aware VMEM budgeting.
# ---------------------------------------------------------------------------
def _vmem_params():
    """Returns (tile budget bytes, vmem_limit_bytes, require >= 2 grid steps)."""
    vmem_cap = None
    try:
        info = pltpu.get_tpu_info()
        vmem_cap = int(getattr(info, "vmem_capacity_bytes"))
    except Exception:
        vmem_cap = None
    if vmem_cap is not None and vmem_cap >= 100 * 1024 * 1024:
        # v5e / v6e: 128 MiB VMEM, single TensorCore -> go big, no 2-step guard.
        return 48 * 1024 * 1024, 64 * 1024 * 1024, False
    # v7x (64 MiB per TC) or unknown -> conservative, keep both cores fed.
    return 20 * 1024 * 1024, 32 * 1024 * 1024, True


def _round_up(x, m):
    return (x + m - 1) // m * m


# ---------------------------------------------------------------------------
# Tile-size heuristic: largest divisor of BC whose PADDED, double-buffered
# block footprint fits the budget.  Candidates are multiples of 8 (sublane
# alignment) or BC itself (full-extent block is always legal).
# ---------------------------------------------------------------------------
def _pick_tile_bc(bc, flat_in, flat_out, vmem_budget_bytes, want_two_steps):
    # Resident Kron matrix (constant index_map; count its double buffer too).
    k_bytes = 2 * _round_up(flat_in, 8) * _round_up(flat_out, 128) * 4

    def footprint(t):
        sub = _round_up(t, 8)
        blk_x = sub * _round_up(flat_in, 128) * 4            # input block
        blk_o = sub * _round_up(flat_out, 128) * 4           # output block
        blk_sb = 2 * sub * 128 * 4                           # scale + bias
        compute = sub * _round_up(flat_out, 128) * 4         # f32 matmul result
        return 2 * (blk_x + blk_o + blk_sb) + compute + k_bytes

    cands = sorted({d for d in range(8, bc + 1, 8) if bc % d == 0} | {bc})
    valid = [d for d in cands if footprint(d) <= vmem_budget_bytes]
    if not valid:
        return min(cands)                 # smallest legal tile (budget << limit)
    if want_two_steps:
        two_step = [d for d in valid if bc // d >= 2]
        if two_step:
            return max(two_step)          # v7x: keep both TensorCores busy
    return max(valid)


# ---------------------------------------------------------------------------
# Wrapper
# ---------------------------------------------------------------------------
def kornia_transforms_forward(x, mean, std, out_hw):
    """x: (B, C, H, W) float32; mean/std: (C,) float32; out_hw: (H_out, W_out)."""
    B, C, H_in, W_in = x.shape
    H_out, W_out = out_hw
    BC = B * C
    flat_in = H_in * W_in
    flat_out = H_out * W_out

    # Kronecker-combined separable bilinear matrix:
    #   K[h*W_in + w, o*W_out + q] = Wh[o, h] * Ww[q, w]
    wh = bilinear_matrix(H_in, H_out)                    # (H_out, H_in)
    ww = bilinear_matrix(W_in, W_out)                    # (W_out, W_in)
    kmat = jnp.asarray(np.kron(wh.T, ww.T))              # (flat_in, flat_out)

    # Fused affine normalize:  (y - mean) / std == y * (1/std) + (-mean/std)
    inv_std = 1.0 / std.astype(jnp.float32)              # (C,)
    neg_mean_s = -mean.astype(jnp.float32) * inv_std     # (C,)
    scale_bc = jnp.broadcast_to(inv_std[None, :], (B, C)).reshape(BC, 1)
    bias_bc = jnp.broadcast_to(neg_mean_s[None, :], (B, C)).reshape(BC, 1)

    x_flat = x.reshape(BC, flat_in)                      # free, lane-dense

    budget, vmem_limit, want_two = _vmem_params()
    tile_bc = _pick_tile_bc(BC, flat_in, flat_out, budget, want_two)
    grid = (BC // tile_bc,)

    out_flat = pl.pallas_call(
        resize_normalize_kernel,
        out_shape=jax.ShapeDtypeStruct((BC, flat_out), jnp.float32),
        grid=grid,
        in_specs=[
            # Constant index_map -> fetched once, stays resident across steps.
            pl.BlockSpec((flat_in, flat_out), lambda i: (0, 0)),       # K
            pl.BlockSpec((tile_bc, 1), lambda i: (i, 0)),              # scale
            pl.BlockSpec((tile_bc, 1), lambda i: (i, 0)),              # bias
            pl.BlockSpec((tile_bc, flat_in), lambda i: (i, 0)),        # x slabs
        ],
        out_specs=pl.BlockSpec((tile_bc, flat_out), lambda i: (i, 0)),
        compiler_params=pltpu.CompilerParams(
            dimension_semantics=("parallel",),
            vmem_limit_bytes=vmem_limit,
        ),
    )(kmat, scale_bc, bias_bc, x_flat)

    return out_flat.reshape(B, C, H_out, W_out)          # free reshape


# ---------------------------------------------------------------------------
# Plain-JAX reference (separable form; matches torch/kornia bilinear resize
# with align_corners=False, then Normalize).
# ---------------------------------------------------------------------------
def reference_forward(x, mean, std, out_hw):
    B, C, H_in, W_in = x.shape
    H_out, W_out = out_hw
    wh = jnp.asarray(bilinear_matrix(H_in, H_out))       # (H_out, H_in)
    ww = jnp.asarray(bilinear_matrix(W_in, W_out))       # (W_out, W_in)
    y = jnp.einsum("oh,bchw->bcow", wh, x)
    y = jnp.einsum("bcow,qw->bcoq", y, ww)
    return (y - mean[None, :, None, None]) / std[None, :, None, None]


if __name__ == "__main__":
    B, C, H, W = 2, 4, 16, 16
    OUT_HW = (32, 32)

    key = jax.random.PRNGKey(0)
    x = jax.random.uniform(key, (B, C, H, W), dtype=jnp.float32)

    # Deterministic per-channel normalization parameters (kornia Normalize).
    mean = jnp.array([0.485, 0.456, 0.406, 0.5][:C], dtype=jnp.float32)
    std = jnp.array([0.229, 0.224, 0.225, 0.25][:C], dtype=jnp.float32)

    out = kornia_transforms_forward(x, mean, std, OUT_HW)
    out = jax.block_until_ready(out)

    ref = reference_forward(x, mean, std, OUT_HW)
    assert out.shape == (B, C, OUT_HW[0], OUT_HW[1])
    assert out.dtype == jnp.float32
    np.testing.assert_allclose(np.asarray(out), np.asarray(ref),
                               rtol=1e-5, atol=1e-5)

    # TODO(synk): stochastic Kornia augs (RandomCrop / RandomResizedCrop /
    # RandomHorizontalFlip / CenterCrop) are config-optional and not part of
    # the chosen deterministic pipeline; they would need in-kernel PRNG
    # (pltpu.prng_seed / pltpu.prng_random_bits).
    print("KERNEL_OK")
</pallas_src>

<mosaic_0001>
module attributes {stable_mosaic.version = 11 : i64} {
  func.func @resize_normalize_kernel(%arg0: i32, %arg1: memref<256x1024xf32, #tpu.memory_space<vmem>>, %arg2: memref<8x1xf32, #tpu.memory_space<vmem>>, %arg3: memref<8x1xf32, #tpu.memory_space<vmem>>, %arg4: memref<8x256xf32, #tpu.memory_space<vmem>>, %arg5: memref<8x1024xf32, #tpu.memory_space<vmem>>) attributes {dimension_semantics = [#tpu.dimension_semantics<parallel>], iteration_bounds = array<i64: 1>, scalar_prefetch = 0 : i64, scratch_operands = 0 : i64, tpu.core_type = #tpu.core_type<tc>, window_params = [{pipeline_mode = #tpu.pipeline_mode<synchronous>, transform_indices = @transform_0, window_bounds = array<i64: 256, 1024>}, {transform_indices = @transform_1, window_bounds = array<i64: 8, 1>}, {transform_indices = @transform_2, window_bounds = array<i64: 8, 1>}, {transform_indices = @transform_3, window_bounds = array<i64: 8, 256>}, {transform_indices = @transform_4, window_bounds = array<i64: 8, 1024>}]} {
    %c0 = arith.constant 0 : index
    %c0_0 = arith.constant 0 : index
    %0 = vector.load %arg4[%c0, %c0_0] : memref<8x256xf32, #tpu.memory_space<vmem>>, vector<8x256xf32>
    %c0_1 = arith.constant 0 : index
    %c0_2 = arith.constant 0 : index
    %1 = vector.load %arg1[%c0_1, %c0_2] : memref<256x1024xf32, #tpu.memory_space<vmem>>, vector<256x1024xf32>
    %cst = arith.constant dense<0.000000e+00> : vector<8x1024xf32>
    %2 = tpu.matmul %0, %1, %cst {dimension_numbers = #tpu.dot_dimension_numbers<[1], [0], [0], [1], [0, 0, 1, 1], [], []>} : vector<8x256xf32>, vector<256x1024xf32>, vector<8x1024xf32> -> vector<8x1024xf32>
    %c0_3 = arith.constant 0 : index
    %c0_4 = arith.constant 0 : index
    %3 = vector.load %arg2[%c0_3, %c0_4] : memref<8x1xf32, #tpu.memory_space<vmem>>, vector<8x1xf32>
    %4 = vector.broadcast %3 : vector<8x1xf32> to vector<8x1024xf32>
    %5 = arith.mulf %2, %4 : vector<8x1024xf32>
    %c0_5 = arith.constant 0 : index
    %c0_6 = arith.constant 0 : index
    %6 = vector.load %arg3[%c0_5, %c0_6] : memref<8x1xf32, #tpu.memory_space<vmem>>, vector<8x1xf32>
    %7 = vector.broadcast %6 : vector<8x1xf32> to vector<8x1024xf32>
    %8 = arith.addf %5, %7 : vector<8x1024xf32>
    %c0_7 = arith.constant 0 : index
    %c0_8 = arith.constant 0 : index
    %9 = vector.load %arg5[%c0_7, %c0_8] : memref<8x1024xf32, #tpu.memory_space<vmem>>, vector<8x1024xf32>
    tpu.vector_store %arg5[%c0_7, %c0_8], %8 {strides = array<i32>} : memref<8x1024xf32, #tpu.memory_space<vmem>>, vector<8x1024xf32>,
    return
  }
  func.func @transform_0(%arg0: i32) -> (i32, i32) {
    %c0_i32 = arith.constant 0 : i32
    %c0_i32_0 = arith.constant 0 : i32
    %c0_i32_1 = arith.constant 0 : i32
    return %c0_i32, %c0_i32_0 : i32, i32
  }
  func.func @transform_1(%arg0: i32) -> (i32, i32) {
    %c0_i32 = arith.constant 0 : i32
    %c0_i32_0 = arith.constant 0 : i32
    return %arg0, %c0_i32 : i32, i32
  }
  func.func @transform_2(%arg0: i32) -> (i32, i32) {
    %c0_i32 = arith.constant 0 : i32
    %c0_i32_0 = arith.constant 0 : i32
    return %arg0, %c0_i32 : i32, i32
  }
  func.func @transform_3(%arg0: i32) -> (i32, i32) {
    %c0_i32 = arith.constant 0 : i32
    %c0_i32_0 = arith.constant 0 : i32
    return %arg0, %c0_i32 : i32, i32
  }
  func.func @transform_4(%arg0: i32) -> (i32, i32) {
    %c0_i32 = arith.constant 0 : i32
    %c0_i32_0 = arith.constant 0 : i32
    return %arg0, %c0_i32 : i32, i32
  }
}

</mosaic_0001>

<bundles_post_ra>
// kernel: tpu_custom_call.1
= control target key start
LH: loop header
LB: loop body
LE: loop exit
PB: predicated region body
PF: predicated region fallthrough
CT: control target
= control target key end

     0   :  { %9 = vsyncpa [#allocation3], 0  ;;  %s791_s0 = inlined_call_operand.hbm [shape: f32[256,1024], index: 0, kind: input, shape index: {}]   ;;  %s792_s1 = inlined_call_operand.vmem [shape: f32[8,1], index: 1, kind: input, shape index: {}]   ;;  %s793_s2 = inlined_call_operand.vmem [shape: f32[8,1], index: 2, kind: input, shape index: {}]   ;;  %s794_s3 = inlined_call_operand.vmem [shape: f32[8,256], index: 3, kind: input, shape index: {}]   ;;  %s795_s4 = inlined_call_operand.hbm [shape: f32[8,1024], index: 4, kind: output, shape index: {}]  }
   0x1   :  { %10 = vsyncpa [#allocation4], 0  ;;  %s15_s17 = sshll.u32 %s791_s0, 4  ;;  %s723_s18 = smov [#allocation2]   ;;  %s16_s17 = int_to_ptr.hbm [resolvable:$true] %s15_s17 }
   0x2   :  { %s17_s19 = sshll.u32 %s723_s18, 4  ;;  %s724_s20 = smov 1024   ;;  %s18_s19 = int_to_ptr.vmem [resolvable:$true] %s17_s19 }
   0x3   :  { %s725_s21 = smov 64  }
   0x4   :  { %23 = dma.hbm_to_vmem [thread:$0]  %s16_s17, 32768, %s18_s19, [#allocation3], %s724_s20, %s724_s20, %s725_s21  }
   0x5   :  { %719 = dma.done.wait [#allocation3], 32768  }
   0x6   :  { %720 = vsyncadd [#allocation3], 4294934528  ;;  %v156_v0 = vld [vmem:[#allocation2 + $0x3c0] sm:$0xff]  ;;  %v157_v2 = vld [vmem:[#allocation2 + $0x3c8] sm:$0xff]  ;;  %s655_s30 = sshll.u32 %s795_s4, 4  ;;  %s656_s30 = int_to_ptr.hbm [resolvable:$true] %s655_s30 }
   0x7   :  { %v284_v1 = vld [vmem:[#allocation2 + $0x7c0] sm:$0xff]  ;;  %292 = vmatpush.msra.mxu0 %v156_v0  ;;  %v285_v3 = vld [vmem:[#allocation2 + $0x7c8] sm:$0xff]  ;;  %332 = vmatpush.msra.mxu2 %v157_v2  ;;  %v158_v0 = vld [vmem:[#allocation2 + $0x3d0] sm:$0xff] }
   0x8   :  { %312 = vmatpush.msra.mxu1 %v284_v1  ;;  %v148_v4 = vld [vmem:[#allocation2 + $0x380] sm:$0xff]  ;;  %352 = vmatpush.msra.mxu3 %v285_v3  ;;  %v149_v6 = vld [vmem:[#allocation2 + $0x388] sm:$0xff]  ;;  %v286_v1 = vld [vmem:[#allocation2 + $0x7d0] sm:$0xff] }
   0x9   :  { %v276_v5 = vld [vmem:[#allocation2 + $0x780] sm:$0xff]  ;;  %v277_v7 = vld [vmem:[#allocation2 + $0x788] sm:$0xff]  ;;  %293 = vmatpush.msra.mxu0 %v148_v4  ;;  %333 = vmatpush.msra.mxu2 %v149_v6  ;;  %v159_v2 = vld [vmem:[#allocation2 + $0x3d8] sm:$0xff] }
   0xa   :  { %v140_v8 = vld [vmem:[#allocation2 + $0x340] sm:$0xff]  ;;  %313 = vmatpush.msra.mxu1 %v276_v5  ;;  %v141_v10 = vld [vmem:[#allocation2 + $0x348] sm:$0xff]  ;;  %353 = vmatpush.msra.mxu3 %v277_v7  ;;  %v287_v3 = vld [vmem:[#allocation2 + $0x7d8] sm:$0xff] }
   0xb   :  { %v268_v9 = vld [vmem:[#allocation2 + $0x740] sm:$0xff]  ;;  %v269_v11 = vld [vmem:[#allocation2 + $0x748] sm:$0xff]  ;;  %294 = vmatpush.msra.mxu0 %v140_v8  ;;  %334 = vmatpush.msra.mxu2 %v141_v10  ;;  %v150_v4 = vld [vmem:[#allocation2 + $0x390] sm:$0xff] }
   0xc   :  { %v132_v12 = vld [vmem:[#allocation2 + $0x300] sm:$0xff]  ;;  %314 = vmatpush.msra.mxu1 %v268_v9  ;;  %v133_v14 = vld [vmem:[#allocation2 + $0x308] sm:$0xff]  ;;  %354 = vmatpush.msra.mxu3 %v269_v11  ;;  %v278_v5 = vld [vmem:[#allocation2 + $0x790] sm:$0xff] }
   0xd   :  { %v260_v13 = vld [vmem:[#allocation2 + $0x700] sm:$0xff]  ;;  %v261_v15 = vld [vmem:[#allocation2 + $0x708] sm:$0xff]  ;;  %295 = vmatpush.msra.mxu0 %v132_v12  ;;  %335 = vmatpush.msra.mxu2 %v133_v14  ;;  %v151_v6 = vld [vmem:[#allocation2 + $0x398] sm:$0xff] }
   0xe   :  { %v124_v16 = vld [vmem:[#allocation2 + $0x2c0] sm:$0xff]  ;;  %315 = vmatpush.msra.mxu1 %v260_v13  ;;  %v125_v18 = vld [vmem:[#allocation2 + $0x2c8] sm:$0xff]  ;;  %355 = vmatpush.msra.mxu3 %v261_v15  ;;  %v279_v7 = vld [vmem:[#allocation2 + $0x798] sm:$0xff] }
   0xf   :  { %v252_v17 = vld [vmem:[#allocation2 + $0x6c0] sm:$0xff]  ;;  %v253_v19 = vld [vmem:[#allocation2 + $0x6c8] sm:$0xff]  ;;  %296 = vmatpush.msra.mxu0 %v124_v16  ;;  %336 = vmatpush.msra.mxu2 %v125_v18  ;;  %v142_v8 = vld [vmem:[#allocation2 + $0x350] sm:$0xff] }
  0x10   :  { %v116_v20 = vld [vmem:[#allocation2 + $0x280] sm:$0xff]  ;;  %316 = vmatpush.msra.mxu1 %v252_v17  ;;  %v117_v22 = vld [vmem:[#allocation2 + $0x288] sm:$0xff]  ;;  %356 = vmatpush.msra.mxu3 %v253_v19  ;;  %v270_v9 = vld [vmem:[#allocation2 + $0x750] sm:$0xff] }
  0x11   :  { %v244_v21 = vld [vmem:[#allocation2 + $0x680] sm:$0xff]  ;;  %v245_v23 = vld [vmem:[#allocation2 + $0x688] sm:$0xff]  ;;  %297 = vmatpush.msra.mxu0 %v116_v20  ;;  %337 = vmatpush.msra.mxu2 %v117_v22  ;;  %v143_v10 = vld [vmem:[#allocation2 + $0x358] sm:$0xff] }
  0x12   :  { %v108_v24 = vld [vmem:[#allocation2 + $0x240] sm:$0xff]  ;;  %317 = vmatpush.msra.mxu1 %v244_v21  ;;  %v109_v26 = vld [vmem:[#allocation2 + $0x248] sm:$0xff]  ;;  %357 = vmatpush.msra.mxu3 %v245_v23  ;;  %v271_v11 = vld [vmem:[#allocation2 + $0x758] sm:$0xff] }
  0x13   :  { %v236_v25 = vld [vmem:[#allocation2 + $0x640] sm:$0xff]  ;;  %v237_v27 = vld [vmem:[#allocation2 + $0x648] sm:$0xff]  ;;  %298 = vmatpush.msra.mxu0 %v108_v24  ;;  %338 = vmatpush.msra.mxu2 %v109_v26  ;;  %v134_v12 = vld [vmem:[#allocation2 + $0x310] sm:$0xff] }
  0x14   :  { %v100_v28 = vld [vmem:[#allocation2 + $0x200] sm:$0xff]  ;;  %318 = vmatpush.msra.mxu1 %v236_v25  ;;  %v101_v30 = vld [vmem:[#allocation2 + $0x208] sm:$0xff]  ;;  %358 = vmatpush.msra.mxu3 %v237_v27  ;;  %v262_v13 = vld [vmem:[#allocation2 + $0x710] sm:$0xff] }
  0x15   :  { %v228_v29 = vld [vmem:[#allocation2 + $0x600] sm:$0xff]  ;;  %v229_v31 = vld [vmem:[#allocation2 + $0x608] sm:$0xff]  ;;  %299 = vmatpush.msra.mxu0 %v100_v28  ;;  %339 = vmatpush.msra.mxu2 %v101_v30  ;;  %v135_v14 = vld [vmem:[#allocation2 + $0x318] sm:$0xff] }
  0x16   :  { %v92_v32 = vld [vmem:[#allocation2 + $0x1c0] sm:$0xff]  ;;  %319 = vmatpush.msra.mxu1 %v228_v29  ;;  %v93_v34 = vld [vmem:[#allocation2 + $0x1c8] sm:$0xff]  ;;  %359 = vmatpush.msra.mxu3 %v229_v31  ;;  %v263_v15 = vld [vmem:[#allocation2 + $0x718] sm:$0xff] }
  0x17   :  { %v220_v33 = vld [vmem:[#allocation2 + $0x5c0] sm:$0xff]  ;;  %v221_v35 = vld [vmem:[#allocation2 + $0x5c8] sm:$0xff]  ;;  %300 = vmatpush.msra.mxu0 %v92_v32  ;;  %340 = vmatpush.msra.mxu2 %v93_v34  ;;  %v126_v16 = vld [vmem:[#allocation2 + $0x2d0] sm:$0xff] }
  0x18   :  { %v84_v36 = vld [vmem:[#allocation2 + $0x180] sm:$0xff]  ;;  %320 = vmatpush.msra.mxu1 %v220_v33  ;;  %v85_v38 = vld [vmem:[#allocation2 + $0x188] sm:$0xff]  ;;  %360 = vmatpush.msra.mxu3 %v221_v35  ;;  %v254_v17 = vld [vmem:[#allocation2 + $0x6d0] sm:$0xff] }
  0x19   :  { %v212_v37 = vld [vmem:[#allocation2 + $0x580] sm:$0xff]  ;;  %v213_v39 = vld [vmem:[#allocation2 + $0x588] sm:$0xff]  ;;  %301 = vmatpush.msra.mxu0 %v84_v36  ;;  %341 = vmatpush.msra.mxu2 %v85_v38  ;;  %v127_v18 = vld [vmem:[#allocation2 + $0x2d8] sm:$0xff] }
  0x1a   :  { %v76_v40 = vld [vmem:[#allocation2 + $0x140] sm:$0xff]  ;;  %321 = vmatpush.msra.mxu1 %v212_v37  ;;  %v77_v42 = vld [vmem:[#allocation2 + $0x148] sm:$0xff]  ;;  %361 = vmatpush.msra.mxu3 %v213_v39  ;;  %v255_v19 = vld [vmem:[#allocation2 + $0x6d8] sm:$0xff] }
  0x1b   :  { %v204_v41 = vld [vmem:[#allocation2 + $0x540] sm:$0xff]  ;;  %v205_v43 = vld [vmem:[#allocation2 + $0x548] sm:$0xff]  ;;  %302 = vmatpush.msra.mxu0 %v76_v40  ;;  %342 = vmatpush.msra.mxu2 %v77_v42  ;;  %v118_v20 = vld [vmem:[#allocation2 + $0x290] sm:$0xff] }
  0x1c   :  { %v68_v44 = vld [vmem:[#allocation2 + $0x100] sm:$0xff]  ;;  %322 = vmatpush.msra.mxu1 %v204_v41  ;;  %v69_v46 = vld [vmem:[#allocation2 + $0x108] sm:$0xff]  ;;  %362 = vmatpush.msra.mxu3 %v205_v43  ;;  %v246_v21 = vld [vmem:[#allocation2 + $0x690] sm:$0xff] }
  0x1d   :  { %v196_v45 = vld [vmem:[#allocation2 + $0x500] sm:$0xff]  ;;  %v197_v47 = vld [vmem:[#allocation2 + $0x508] sm:$0xff]  ;;  %303 = vmatpush.msra.mxu0 %v68_v44  ;;  %343 = vmatpush.msra.mxu2 %v69_v46  ;;  %v119_v22 = vld [vmem:[#allocation2 + $0x298] sm:$0xff] }
  0x1e   :  { %v60_v48 = vld [vmem:[#allocation2 + $0xc0] sm:$0xff]  ;;  %323 = vmatpush.msra.mxu1 %v196_v45  ;;  %v61_v50 = vld [vmem:[#allocation2 + $0xc8] sm:$0xff]  ;;  %363 = vmatpush.msra.mxu3 %v197_v47  ;;  %v247_v23 = vld [vmem:[#allocation2 + $0x698] sm:$0xff] }
  0x1f   :  { %v188_v49 = vld [vmem:[#allocation2 + $0x4c0] sm:$0xff]  ;;  %v189_v51 = vld [vmem:[#allocation2 + $0x4c8] sm:$0xff]  ;;  %304 = vmatpush.msra.mxu0 %v60_v48  ;;  %344 = vmatpush.msra.mxu2 %v61_v50  ;;  %v110_v24 = vld [vmem:[#allocation2 + $0x250] sm:$0xff] }
  0x20   :  { %v52_v52 = vld [vmem:[#allocation2 + $0x80] sm:$0xff]  ;;  %324 = vmatpush.msra.mxu1 %v188_v49  ;;  %v53_v54 = vld [vmem:[#allocation2 + $0x88] sm:$0xff]  ;;  %364 = vmatpush.msra.mxu3 %v189_v51  ;;  %v238_v25 = vld [vmem:[#allocation2 + $0x650] sm:$0xff] }
  0x21   :  { %v180_v53 = vld [vmem:[#allocation2 + $0x480] sm:$0xff]  ;;  %v181_v55 = vld [vmem:[#allocation2 + $0x488] sm:$0xff]  ;;  %305 = vmatpush.msra.mxu0 %v52_v52  ;;  %345 = vmatpush.msra.mxu2 %v53_v54  ;;  %v111_v26 = vld [vmem:[#allocation2 + $0x258] sm:$0xff] }
  0x22   :  { %v44_v56 = vld [vmem:[#allocation2 + $0x40] sm:$0xff]  ;;  %325 = vmatpush.msra.mxu1 %v180_v53  ;;  %v45_v58 = vld [vmem:[#allocation2 + $0x48] sm:$0xff]  ;;  %365 = vmatpush.msra.mxu3 %v181_v55  ;;  %v239_v27 = vld [vmem:[#allocation2 + $0x658] sm:$0xff] }
  0x23   :  { %v172_v57 = vld [vmem:[#allocation2 + $0x440] sm:$0xff]  ;;  %v173_v59 = vld [vmem:[#allocation2 + $0x448] sm:$0xff]  ;;  %306 = vmatpush.msra.mxu0 %v44_v56  ;;  %346 = vmatpush.msra.mxu2 %v45_v58  ;;  %v102_v28 = vld [vmem:[#allocation2 + $0x210] sm:$0xff] }
  0x24   :  { %v36_v60 = vld [vmem:[#allocation2] sm:$0xff]  ;;  %326 = vmatpush.msra.mxu1 %v172_v57  ;;  %v37_v62 = vld [vmem:[#allocation2 + $0x8] sm:$0xff]  ;;  %366 = vmatpush.msra.mxu3 %v173_v59  ;;  %v230_v29 = vld [vmem:[#allocation2 + $0x610] sm:$0xff] }
  0x25   :  { %v164_v61 = vld [vmem:[#allocation2 + $0x400] sm:$0xff]  ;;  %v165_v63 = vld [vmem:[#allocation2 + $0x408] sm:$0xff]  ;;  %307 = vmatpush.msra.mxu0 %v36_v60  ;;  %347 = vmatpush.msra.mxu2 %v37_v62  ;;  %v103_v30 = vld [vmem:[#allocation2 + $0x218] sm:$0xff] }
  0x26   :  { %327 = vmatpush.msra.mxu1 %v164_v61  ;;  %367 = vmatpush.msra.mxu3 %v165_v63  ;;  %v231_v31 = vld [vmem:[#allocation2 + $0x618] sm:$0xff]  ;;  %v94_v32 = vld [vmem:[#allocation2 + $0x1d0] sm:$0xff] }
  0x27   :  { %372 = vmatpush.msrb.mxu0 %v158_v0  ;;  %412 = vmatpush.msrb.mxu2 %v159_v2  ;;  %v222_v33 = vld [vmem:[#allocation2 + $0x5d0] sm:$0xff]  ;;  %v95_v34 = vld [vmem:[#allocation2 + $0x1d8] sm:$0xff]  ;;  %v759_v0 = vld [vmem:[%s794_s3] sm:$0xff] }
  0x28   :  { %392 = vmatpush.msrb.mxu1 %v286_v1  ;;  %432 = vmatpush.msrb.mxu3 %v287_v3  ;;  %v223_v35 = vld [vmem:[#allocation2 + $0x5d8] sm:$0xff]  ;;  %v86_v36 = vld [vmem:[#allocation2 + $0x190] sm:$0xff]  ;;  %v764_v1 = vld [vmem:[%s794_s3 + $0x8] sm:$0xff] }
  0x29   :  { %373 = vmatpush.msrb.mxu0 %v150_v4  ;;  %413 = vmatpush.msrb.mxu2 %v151_v6  ;;  %v214_v37 = vld [vmem:[#allocation2 + $0x590] sm:$0xff]  ;;  %v87_v38 = vld [vmem:[#allocation2 + $0x198] sm:$0xff]  ;;  %v160_v2 = vld [vmem:[#allocation2 + $0x3e0] sm:$0xff] }
  0x2a   :  { %393 = vmatpush.msrb.mxu1 %v278_v5  ;;  %433 = vmatpush.msrb.mxu3 %v279_v7  ;;  %v215_v39 = vld [vmem:[#allocation2 + $0x598] sm:$0xff]  ;;  %v78_v40 = vld [vmem:[#allocation2 + $0x150] sm:$0xff]  ;;  %v288_v3 = vld [vmem:[#allocation2 + $0x7e0] sm:$0xff] }
  0x2b   :  { %374 = vmatpush.msrb.mxu0 %v142_v8  ;;  %414 = vmatpush.msrb.mxu2 %v143_v10  ;;  %v206_v41 = vld [vmem:[#allocation2 + $0x550] sm:$0xff]  ;;  %v79_v42 = vld [vmem:[#allocation2 + $0x158] sm:$0xff]  ;;  %v161_v4 = vld [vmem:[#allocation2 + $0x3e8] sm:$0xff] }
  0x2c   :  { %394 = vmatpush.msrb.mxu1 %v270_v9  ;;  %434 = vmatpush.msrb.mxu3 %v271_v11  ;;  %v207_v43 = vld [vmem:[#allocation2 + $0x558] sm:$0xff]  ;;  %v70_v44 = vld [vmem:[#allocation2 + $0x110] sm:$0xff]  ;;  %v289_v5 = vld [vmem:[#allocation2 + $0x7e8] sm:$0xff] }
  0x2d   :  { %375 = vmatpush.msrb.mxu0 %v134_v12  ;;  %415 = vmatpush.msrb.mxu2 %v135_v14  ;;  %v198_v45 = vld [vmem:[#allocation2 + $0x510] sm:$0xff]  ;;  %v71_v46 = vld [vmem:[#allocation2 + $0x118] sm:$0xff]  ;;  %v152_v6 = vld [vmem:[#allocation2 + $0x3a0] sm:$0xff] }
  0x2e   :  { %395 = vmatpush.msrb.mxu1 %v262_v13  ;;  %435 = vmatpush.msrb.mxu3 %v263_v15  ;;  %v199_v47 = vld [vmem:[#allocation2 + $0x518] sm:$0xff]  ;;  %v62_v48 = vld [vmem:[#allocation2 + $0xd0] sm:$0xff]  ;;  %v280_v7 = vld [vmem:[#allocation2 + $0x7a0] sm:$0xff] }
  0x2f   :  { %376 = vmatpush.msrb.mxu0 %v126_v16  ;;  %416 = vmatpush.msrb.mxu2 %v127_v18  ;;  %v190_v49 = vld [vmem:[#allocation2 + $0x4d0] sm:$0xff]  ;;  %v63_v50 = vld [vmem:[#allocation2 + $0xd8] sm:$0xff]  ;;  %v153_v8 = vld [vmem:[#allocation2 + $0x3a8] sm:$0xff] }
  0x30   :  { %396 = vmatpush.msrb.mxu1 %v254_v17  ;;  %436 = vmatpush.msrb.mxu3 %v255_v19  ;;  %v191_v51 = vld [vmem:[#allocation2 + $0x4d8] sm:$0xff]  ;;  %v54_v52 = vld [vmem:[#allocation2 + $0x90] sm:$0xff]  ;;  %v281_v9 = vld [vmem:[#allocation2 + $0x7a8] sm:$0xff] }
  0x31   :  { %377 = vmatpush.msrb.mxu0 %v118_v20  ;;  %417 = vmatpush.msrb.mxu2 %v119_v22  ;;  %v182_v53 = vld [vmem:[#allocation2 + $0x490] sm:$0xff]  ;;  %v55_v54 = vld [vmem:[#allocation2 + $0x98] sm:$0xff]  ;;  %v144_v10 = vld [vmem:[#allocation2 + $0x360] sm:$0xff] }
  0x32   :  { %397 = vmatpush.msrb.mxu1 %v246_v21  ;;  %437 = vmatpush.msrb.mxu3 %v247_v23  ;;  %v183_v55 = vld [vmem:[#allocation2 + $0x498] sm:$0xff]  ;;  %v46_v56 = vld [vmem:[#allocation2 + $0x50] sm:$0xff]  ;;  %v272_v11 = vld [vmem:[#allocation2 + $0x760] sm:$0xff] }
  0x33   :  { %378 = vmatpush.msrb.mxu0 %v110_v24  ;;  %418 = vmatpush.msrb.mxu2 %v111_v26  ;;  %v174_v57 = vld [vmem:[#allocation2 + $0x450] sm:$0xff]  ;;  %v47_v58 = vld [vmem:[#allocation2 + $0x58] sm:$0xff]  ;;  %v145_v12 = vld [vmem:[#allocation2 + $0x368] sm:$0xff] }
  0x34   :  { %398 = vmatpush.msrb.mxu1 %v238_v25  ;;  %438 = vmatpush.msrb.mxu3 %v239_v27  ;;  %v175_v59 = vld [vmem:[#allocation2 + $0x458] sm:$0xff]  ;;  %v38_v60 = vld [vmem:[#allocation2 + $0x10] sm:$0xff]  ;;  %v273_v13 = vld [vmem:[#allocation2 + $0x768] sm:$0xff] }
  0x35   :  { %379 = vmatpush.msrb.mxu0 %v102_v28  ;;  %419 = vmatpush.msrb.mxu2 %v103_v30  ;;  %v166_v61 = vld [vmem:[#allocation2 + $0x410] sm:$0xff]  ;;  %v39_v62 = vld [vmem:[#allocation2 + $0x18] sm:$0xff]  ;;  %v136_v14 = vld [vmem:[#allocation2 + $0x320] sm:$0xff] }
  0x36   :  { %399 = vmatpush.msrb.mxu1 %v230_v29  ;;  %439 = vmatpush.msrb.mxu3 %v231_v31  ;;  %v167_v63 = vld [vmem:[#allocation2 + $0x418] sm:$0xff]  ;;  %v264_v15 = vld [vmem:[#allocation2 + $0x720] sm:$0xff]  ;;  %v137_v16 = vld [vmem:[#allocation2 + $0x328] sm:$0xff]  ;;  %v726_v31 = vmov 0  }
  0x37   :  { %380 = vmatpush.msrb.mxu0 %v94_v32  ;;  %420 = vmatpush.msrb.mxu2 %v95_v34  ;;  %v265_v17 = vld [vmem:[#allocation2 + $0x728] sm:$0xff]  ;;  %v128_v18 = vld [vmem:[#allocation2 + $0x2e0] sm:$0xff] }
  0x38   :  { %400 = vmatpush.msrb.mxu1 %v222_v33  ;;  %440 = vmatpush.msrb.mxu3 %v223_v35  ;;  %v256_v19 = vld [vmem:[#allocation2 + $0x6e0] sm:$0xff]  ;;  %v129_v20 = vld [vmem:[#allocation2 + $0x2e8] sm:$0xff] }
  0x39   :  { %381 = vmatpush.msrb.mxu0 %v86_v36  ;;  %421 = vmatpush.msrb.mxu2 %v87_v38  ;;  %v257_v21 = vld [vmem:[#allocation2 + $0x6e8] sm:$0xff]  ;;  %v120_v22 = vld [vmem:[#allocation2 + $0x2a0] sm:$0xff] }
  0x3a   :  { %401 = vmatpush.msrb.mxu1 %v214_v37  ;;  %441 = vmatpush.msrb.mxu3 %v215_v39  ;;  %v248_v23 = vld [vmem:[#allocation2 + $0x6a0] sm:$0xff]  ;;  %v121_v24 = vld [vmem:[#allocation2 + $0x2a8] sm:$0xff] }
  0x3b   :  { %382 = vmatpush.msrb.mxu0 %v78_v40  ;;  %422 = vmatpush.msrb.mxu2 %v79_v42  ;;  %v249_v25 = vld [vmem:[#allocation2 + $0x6a8] sm:$0xff]  ;;  %v112_v26 = vld [vmem:[#allocation2 + $0x260] sm:$0xff] }
  0x3c   :  { %402 = vmatpush.msrb.mxu1 %v206_v41  ;;  %442 = vmatpush.msrb.mxu3 %v207_v43  ;;  %v240_v27 = vld [vmem:[#allocation2 + $0x660] sm:$0xff]  ;;  %v113_v28 = vld [vmem:[#allocation2 + $0x268] sm:$0xff] }
  0x3d   :  { %383 = vmatpush.msrb.mxu0 %v70_v44  ;;  %423 = vmatpush.msrb.mxu2 %v71_v46  ;;  %v241_v29 = vld [vmem:[#allocation2 + $0x668] sm:$0xff]  ;;  %v612_v30 = vld [vmem:[%s792_s1] sm:$0xff] }
  0x3e   :  { %403 = vmatpush.msrb.mxu1 %v198_v45  ;;  %443 = vmatpush.msrb.mxu3 %v199_v47  ;;  %v104_v32 = vld [vmem:[#allocation2 + $0x220] sm:$0xff]  ;;  %v105_v34 = vld [vmem:[#allocation2 + $0x228] sm:$0xff] }
  0x3f   :  { %384 = vmatpush.msrb.mxu0 %v62_v48  ;;  %424 = vmatpush.msrb.mxu2 %v63_v50  ;;  %v232_v33 = vld [vmem:[#allocation2 + $0x620] sm:$0xff]  ;;  %v233_v35 = vld [vmem:[#allocation2 + $0x628] sm:$0xff] }
  0x40   :  { %404 = vmatpush.msrb.mxu1 %v190_v49  ;;  %444 = vmatpush.msrb.mxu3 %v191_v51  ;;  %v96_v36 = vld [vmem:[#allocation2 + $0x1e0] sm:$0xff]  ;;  %v97_v38 = vld [vmem:[#allocation2 + $0x1e8] sm:$0xff] }
  0x41   :  { %385 = vmatpush.msrb.mxu0 %v54_v52  ;;  %425 = vmatpush.msrb.mxu2 %v55_v54  ;;  %v224_v37 = vld [vmem:[#allocation2 + $0x5e0] sm:$0xff]  ;;  %v225_v39 = vld [vmem:[#allocation2 + $0x5e8] sm:$0xff] }
  0x42   :  { %405 = vmatpush.msrb.mxu1 %v182_v53  ;;  %445 = vmatpush.msrb.mxu3 %v183_v55  ;;  %v88_v40 = vld [vmem:[#allocation2 + $0x1a0] sm:$0xff]  ;;  %v89_v42 = vld [vmem:[#allocation2 + $0x1a8] sm:$0xff] }
  0x43   :  { %386 = vmatpush.msrb.mxu0 %v46_v56  ;;  %426 = vmatpush.msrb.mxu2 %v47_v58  ;;  %v216_v41 = vld [vmem:[#allocation2 + $0x5a0] sm:$0xff]  ;;  %v217_v43 = vld [vmem:[#allocation2 + $0x5a8] sm:$0xff] }
  0x44   :  { %406 = vmatpush.msrb.mxu1 %v174_v57  ;;  %446 = vmatpush.msrb.mxu3 %v175_v59  ;;  %v80_v44 = vld [vmem:[#allocation2 + $0x160] sm:$0xff]  ;;  %v81_v46 = vld [vmem:[#allocation2 + $0x168] sm:$0xff] }
  0x45   :  { %387 = vmatpush.msrb.mxu0 %v38_v60  ;;  %427 = vmatpush.msrb.mxu2 %v39_v62  ;;  %v208_v45 = vld [vmem:[#allocation2 + $0x560] sm:$0xff]  ;;  %v209_v47 = vld [vmem:[#allocation2 + $0x568] sm:$0xff] }
  0x46   :  { %407 = vmatpush.msrb.mxu1 %v166_v61  ;;  %447 = vmatpush.msrb.mxu3 %v167_v63  ;;  %v626_v48 = vld [vmem:[%s793_s2] sm:$0xff]  ;;  %v73_v51 = vld [vmem:[#allocation2 + $0x128] sm:$0xff]  ;;  %s727_s2 = smov [#allocation5]  }
  0x47   :  { %308 = vmatmul.f32.vlgmr.msra.gmra.mxu0 %v759_v0  ;;  %328 = vmatmul.f32.vlgmr.msra.gmra.mxu1 %v764_v1  ;;  %v72_v49 = vld [vmem:[#allocation2 + $0x120] sm:$0xff]  ;;  %v201_v52 = vld [vmem:[#allocation2 + $0x528] sm:$0xff]  ;;  %s653_s27 = sshll.u32 %s727_s2, 4  ;;  %s654_s27 = int_to_ptr.vmem [resolvable:$true] %s653_s27 }
  0x48   :  { %348 = vmatmul.f32.vlgmr.msra.gmra.mxu2 %v759_v0  ;;  %368 = vmatmul.f32.vlgmr.msra.gmra.mxu3 %v764_v1  ;;  %v200_v50 = vld [vmem:[#allocation2 + $0x520] sm:$0xff]  ;;  %v65_v55 = vld [vmem:[#allocation2 + $0xe8] sm:$0xff] }
  0x49   :  { %452 = vmatpush.msra.mxu0 %v160_v2  ;;  %472 = vmatpush.msra.mxu1 %v288_v3  ;;  %v64_v53 = vld [vmem:[#allocation2 + $0xe0] sm:$0xff]  ;;  %v193_v56 = vld [vmem:[#allocation2 + $0x4e8] sm:$0xff] }
  0x4a   :  { %492 = vmatpush.msra.mxu2 %v161_v4  ;;  %512 = vmatpush.msra.mxu3 %v289_v5  ;;  %v192_v54 = vld [vmem:[#allocation2 + $0x4e0] sm:$0xff]  ;;  %v57_v59 = vld [vmem:[#allocation2 + $0xa8] sm:$0xff] }
  0x4b   :  { %453 = vmatpush.msra.mxu0 %v152_v6  ;;  %473 = vmatpush.msra.mxu1 %v280_v7  ;;  %v56_v57 = vld [vmem:[#allocation2 + $0xa0] sm:$0xff]  ;;  %v185_v60 = vld [vmem:[#allocation2 + $0x4a8] sm:$0xff]  ;;  %v162_v7 = vld [vmem:[#allocation2 + $0x3f0] sm:$0xff] }
  0x4c   :  { %493 = vmatpush.msra.mxu2 %v153_v8  ;;  %513 = vmatpush.msra.mxu3 %v281_v9  ;;  %v184_v58 = vld [vmem:[#allocation2 + $0x4a0] sm:$0xff]  ;;  %v49_v63 = vld [vmem:[#allocation2 + $0x68] sm:$0xff]  ;;  %v290_v8 = vld [vmem:[#allocation2 + $0x7f0] sm:$0xff] }
  0x4d   :  { %454 = vmatpush.msra.mxu0 %v144_v10  ;;  %474 = vmatpush.msra.mxu1 %v272_v11  ;;  %v48_v61 = vld [vmem:[#allocation2 + $0x60] sm:$0xff]  ;;  %v177_v2 = vld [vmem:[#allocation2 + $0x468] sm:$0xff]  ;;  %v163_v9 = vld [vmem:[#allocation2 + $0x3f8] sm:$0xff] }
  0x4e   :  { %494 = vmatpush.msra.mxu2 %v145_v12  ;;  %514 = vmatpush.msra.mxu3 %v273_v13  ;;  %v176_v62 = vld [vmem:[#allocation2 + $0x460] sm:$0xff]  ;;  %v41_v5 = vld [vmem:[#allocation2 + $0x28] sm:$0xff]  ;;  %v291_v10 = vld [vmem:[#allocation2 + $0x7f8] sm:$0xff] }
  0x4f   :  { %455 = vmatpush.msra.mxu0 %v136_v14  ;;  %475 = vmatpush.msra.mxu1 %v264_v15  ;;  %v40_v3 = vld [vmem:[#allocation2 + $0x20] sm:$0xff]  ;;  %v169_v6 = vld [vmem:[#allocation2 + $0x428] sm:$0xff]  ;;  %v154_v11 = vld [vmem:[#allocation2 + $0x3b0] sm:$0xff] }
  0x50   :  { %495 = vmatpush.msra.mxu2 %v137_v16  ;;  %515 = vmatpush.msra.mxu3 %v265_v17  ;;  %v168_v4 = vld [vmem:[#allocation2 + $0x420] sm:$0xff]  ;;  %v282_v12 = vld [vmem:[#allocation2 + $0x7b0] sm:$0xff]  ;;  %v155_v13 = vld [vmem:[#allocation2 + $0x3b8] sm:$0xff] }
  0x51   :  { %456 = vmatpush.msra.mxu0 %v128_v18  ;;  %476 = vmatpush.msra.mxu1 %v256_v19  ;;  %v283_v14 = vld [vmem:[#allocation2 + $0x7b8] sm:$0xff]  ;;  %v146_v15 = vld [vmem:[#allocation2 + $0x370] sm:$0xff] }
  0x52   :  { %496 = vmatpush.msra.mxu2 %v129_v20  ;;  %516 = vmatpush.msra.mxu3 %v257_v21  ;;  %v274_v16 = vld [vmem:[#allocation2 + $0x770] sm:$0xff]  ;;  %v147_v17 = vld [vmem:[#allocation2 + $0x378] sm:$0xff] }
  0x53   :  { %457 = vmatpush.msra.mxu0 %v120_v22  ;;  %477 = vmatpush.msra.mxu1 %v248_v23  ;;  %v275_v18 = vld [vmem:[#allocation2 + $0x778] sm:$0xff]  ;;  %v138_v19 = vld [vmem:[#allocation2 + $0x330] sm:$0xff] }
  0x54   :  { %497 = vmatpush.msra.mxu2 %v121_v24  ;;  %517 = vmatpush.msra.mxu3 %v249_v25  ;;  %v266_v20 = vld [vmem:[#allocation2 + $0x730] sm:$0xff]  ;;  %v139_v21 = vld [vmem:[#allocation2 + $0x338] sm:$0xff] }
  0x55   :  { %670 = vset.pattern.permute.xlu0 %v726_v31  ;;  %458 = vmatpush.msra.mxu0 %v112_v26  ;;  %v267_v22 = vld [vmem:[#allocation2 + $0x738] sm:$0xff]  ;;  %v130_v23 = vld [vmem:[#allocation2 + $0x2f0] sm:$0xff] }
  0x56   :  { %478 = vmatpush.msra.mxu1 %v240_v27  ;;  %498 = vmatpush.msra.mxu2 %v113_v28  ;;  %v258_v24 = vld [vmem:[#allocation2 + $0x6f0] sm:$0xff]  ;;  %v131_v25 = vld [vmem:[#allocation2 + $0x2f8] sm:$0xff] }
  0x57   :  { %518 = vmatpush.msra.mxu3 %v241_v29  ;;  %615 = vperm.xlu0 %670, %v612_v30   ;;  %v259_v26 = vld [vmem:[#allocation2 + $0x6f8] sm:$0xff]  ;;  %v122_v27 = vld [vmem:[#allocation2 + $0x2b0] sm:$0xff] }
  0x58   :  { %459 = vmatpush.msra.mxu0 %v104_v32  ;;  %479 = vmatpush.msra.mxu1 %v232_v33  ;;  %v250_v28 = vld [vmem:[#allocation2 + $0x6b0] sm:$0xff]  ;;  %v123_v29 = vld [vmem:[#allocation2 + $0x2b8] sm:$0xff] }
  0x59   :  { %499 = vmatpush.msra.mxu2 %v105_v34  ;;  %519 = vmatpush.msra.mxu3 %v233_v35  ;;  %v251_v30 = vld [vmem:[#allocation2 + $0x6b8] sm:$0xff]  ;;  %v114_v31 = vld [vmem:[#allocation2 + $0x270] sm:$0xff] }
  0x5a   :  { %460 = vmatpush.msra.mxu0 %v96_v36  ;;  %480 = vmatpush.msra.mxu1 %v224_v37  ;;  %v242_v32 = vld [vmem:[#allocation2 + $0x670] sm:$0xff]  ;;  %v115_v33 = vld [vmem:[#allocation2 + $0x278] sm:$0xff] }
  0x5b   :  { %500 = vmatpush.msra.mxu2 %v97_v38  ;;  %520 = vmatpush.msra.mxu3 %v225_v39  ;;  %v243_v34 = vld [vmem:[#allocation2 + $0x678] sm:$0xff]  ;;  %v106_v35 = vld [vmem:[#allocation2 + $0x230] sm:$0xff] }
  0x5c   :  { %461 = vmatpush.msra.mxu0 %v88_v40  ;;  %481 = vmatpush.msra.mxu1 %v216_v41  ;;  %v234_v36 = vld [vmem:[#allocation2 + $0x630] sm:$0xff]  ;;  %v107_v37 = vld [vmem:[#allocation2 + $0x238] sm:$0xff] }
  0x5d   :  { %501 = vmatpush.msra.mxu2 %v89_v42  ;;  %521 = vmatpush.msra.mxu3 %v217_v43  ;;  %v235_v38 = vld [vmem:[#allocation2 + $0x638] sm:$0xff]  ;;  %v98_v39 = vld [vmem:[#allocation2 + $0x1f0] sm:$0xff] }
  0x5e   :  { %462 = vmatpush.msra.mxu0 %v80_v44  ;;  %482 = vmatpush.msra.mxu1 %v208_v45  ;;  %v226_v40 = vld [vmem:[#allocation2 + $0x5f0] sm:$0xff]  ;;  %v99_v41 = vld [vmem:[#allocation2 + $0x1f8] sm:$0xff] }
  0x5f   :  { %502 = vmatpush.msra.mxu2 %v81_v46  ;;  %522 = vmatpush.msra.mxu3 %v209_v47  ;;  %v227_v42 = vld [vmem:[#allocation2 + $0x5f8] sm:$0xff]  ;;  %v90_v43 = vld [vmem:[#allocation2 + $0x1b0] sm:$0xff] }
  0x60   :  { %629 = vperm.xlu0 %670, %v626_v48   ;;  %463 = vmatpush.msra.mxu0 %v72_v49  ;;  %v218_v44 = vld [vmem:[#allocation2 + $0x5b0] sm:$0xff]  ;;  %v91_v45 = vld [vmem:[#allocation2 + $0x1b8] sm:$0xff] }
  0x61   :  { %483 = vmatpush.msra.mxu1 %v200_v50  ;;  %503 = vmatpush.msra.mxu2 %v73_v51  ;;  %v219_v46 = vld [vmem:[#allocation2 + $0x5b8] sm:$0xff]  ;;  %v82_v47 = vld [vmem:[#allocation2 + $0x170] sm:$0xff] }
  0x62   :  { %523 = vmatpush.msra.mxu3 %v201_v52  ;;  %464 = vmatpush.msra.mxu0 %v64_v53  ;;  %v210_v48 = vld [vmem:[#allocation2 + $0x570] sm:$0xff]  ;;  %v83_v49 = vld [vmem:[#allocation2 + $0x178] sm:$0xff] }
  0x63   :  { %484 = vmatpush.msra.mxu1 %v192_v54  ;;  %504 = vmatpush.msra.mxu2 %v65_v55  ;;  %v211_v50 = vld [vmem:[#allocation2 + $0x578] sm:$0xff]  ;;  %v74_v51 = vld [vmem:[#allocation2 + $0x130] sm:$0xff] }
  0x64   :  { %524 = vmatpush.msra.mxu3 %v193_v56  ;;  %465 = vmatpush.msra.mxu0 %v56_v57  ;;  %v202_v52 = vld [vmem:[#allocation2 + $0x530] sm:$0xff]  ;;  %v75_v53 = vld [vmem:[#allocation2 + $0x138] sm:$0xff] }
  0x65   :  { %485 = vmatpush.msra.mxu1 %v184_v58  ;;  %505 = vmatpush.msra.mxu2 %v57_v59  ;;  %v203_v54 = vld [vmem:[#allocation2 + $0x538] sm:$0xff]  ;;  %v66_v55 = vld [vmem:[#allocation2 + $0xf0] sm:$0xff] }
  0x66   :  { %525 = vmatpush.msra.mxu3 %v185_v60  ;;  %466 = vmatpush.msra.mxu0 %v48_v61  ;;  %v194_v56 = vld [vmem:[#allocation2 + $0x4f0] sm:$0xff]  ;;  %v67_v57 = vld [vmem:[#allocation2 + $0xf8] sm:$0xff] }
  0x67   :  { %486 = vmatpush.msra.mxu1 %v176_v62  ;;  %506 = vmatpush.msra.mxu2 %v49_v63  ;;  %v195_v58 = vld [vmem:[#allocation2 + $0x4f8] sm:$0xff]  ;;  %v58_v59 = vld [vmem:[#allocation2 + $0xb0] sm:$0xff] }
  0x68   :  { %526 = vmatpush.msra.mxu3 %v177_v2  ;;  %467 = vmatpush.msra.mxu0 %v40_v3  ;;  %v186_v60 = vld [vmem:[#allocation2 + $0x4b0] sm:$0xff]  ;;  %v59_v61 = vld [vmem:[#allocation2 + $0xb8] sm:$0xff] }
  0x69   :  { %487 = vmatpush.msra.mxu1 %v168_v4  ;;  %507 = vmatpush.msra.mxu2 %v41_v5  ;;  %v187_v62 = vld [vmem:[#allocation2 + $0x4b8] sm:$0xff]  ;;  %v50_v63 = vld [vmem:[#allocation2 + $0x70] sm:$0xff] }
  0x6a   :  { %527 = vmatpush.msra.mxu3 %v169_v6  ;;  %388 = vmatmul.f32.vlgmr.msrb.gmra.mxu0 %v759_v0  ;;  %v178_v2 = vld [vmem:[#allocation2 + $0x470] sm:$0xff]  ;;  %v51_v3 = vld [vmem:[#allocation2 + $0x78] sm:$0xff] }
  0x6b   :  { %408 = vmatmul.f32.vlgmr.msrb.gmra.mxu1 %v764_v1  ;;  %428 = vmatmul.f32.vlgmr.msrb.gmra.mxu2 %v759_v0  ;;  %v179_v4 = vld [vmem:[#allocation2 + $0x478] sm:$0xff]  ;;  %v42_v5 = vld [vmem:[#allocation2 + $0x30] sm:$0xff] }
  0x6c   :  { %448 = vmatmul.f32.vlgmr.msrb.gmra.mxu3 %v764_v1  ;;  %532 = vmatpush.msrb.mxu0 %v162_v7  ;;  %v170_v6 = vld [vmem:[#allocation2 + $0x430] sm:$0xff]  ;;  %v43_v7 = vld [vmem:[#allocation2 + $0x38] sm:$0xff] }
  0x6d   :  { %552 = vmatpush.msrb.mxu1 %v290_v8  ;;  %572 = vmatpush.msrb.mxu2 %v163_v9  ;;  %v171_v8 = vld [vmem:[#allocation2 + $0x438] sm:$0xff] }
  0x6e   :  { %592 = vmatpush.msrb.mxu3 %v291_v10  ;;  %533 = vmatpush.msrb.mxu0 %v154_v11 }
  0x6f   :  { %553 = vmatpush.msrb.mxu1 %v282_v12  ;;  %573 = vmatpush.msrb.mxu2 %v155_v13 }
  0x70   :  { %593 = vmatpush.msrb.mxu3 %v283_v14  ;;  %534 = vmatpush.msrb.mxu0 %v146_v15 }
  0x71   :  { %554 = vmatpush.msrb.mxu1 %v274_v16  ;;  %574 = vmatpush.msrb.mxu2 %v147_v17 }
  0x72   :  { %594 = vmatpush.msrb.mxu3 %v275_v18  ;;  %535 = vmatpush.msrb.mxu0 %v138_v19 }
  0x73   :  { %555 = vmatpush.msrb.mxu1 %v266_v20  ;;  %575 = vmatpush.msrb.mxu2 %v139_v21 }
  0x74   :  { %595 = vmatpush.msrb.mxu3 %v267_v22  ;;  %536 = vmatpush.msrb.mxu0 %v130_v23 }
  0x75   :  { %556 = vmatpush.msrb.mxu1 %v258_v24  ;;  %576 = vmatpush.msrb.mxu2 %v131_v25 }
  0x76   :  { %596 = vmatpush.msrb.mxu3 %v259_v26  ;;  %537 = vmatpush.msrb.mxu0 %v122_v27 }
  0x77   :  { %557 = vmatpush.msrb.mxu1 %v250_v28  ;;  %577 = vmatpush.msrb.mxu2 %v123_v29 }
  0x78   :  { %597 = vmatpush.msrb.mxu3 %v251_v30  ;;  %538 = vmatpush.msrb.mxu0 %v114_v31 }
  0x79   :  { %558 = vmatpush.msrb.mxu1 %v242_v32  ;;  %578 = vmatpush.msrb.mxu2 %v115_v33 }
  0x7a   :  { %598 = vmatpush.msrb.mxu3 %v243_v34  ;;  %539 = vmatpush.msrb.mxu0 %v106_v35 }
  0x7b   :  { %559 = vmatpush.msrb.mxu1 %v234_v36  ;;  %579 = vmatpush.msrb.mxu2 %v107_v37 }
  0x7c   :  { %599 = vmatpush.msrb.mxu3 %v235_v38  ;;  %540 = vmatpush.msrb.mxu0 %v98_v39 }
  0x7d   :  { %560 = vmatpush.msrb.mxu1 %v226_v40  ;;  %580 = vmatpush.msrb.mxu2 %v99_v41 }
  0x7e   :  { %600 = vmatpush.msrb.mxu3 %v227_v42  ;;  %541 = vmatpush.msrb.mxu0 %v90_v43 }
  0x7f   :  { %561 = vmatpush.msrb.mxu1 %v218_v44  ;;  %581 = vmatpush.msrb.mxu2 %v91_v45 }
  0x80   :  { %601 = vmatpush.msrb.mxu3 %v219_v46  ;;  %542 = vmatpush.msrb.mxu0 %v82_v47 }
  0x81   :  { %562 = vmatpush.msrb.mxu1 %v210_v48  ;;  %582 = vmatpush.msrb.mxu2 %v83_v49 }
  0x82   :  { %602 = vmatpush.msrb.mxu3 %v211_v50  ;;  %543 = vmatpush.msrb.mxu0 %v74_v51 }
  0x83   :  { %563 = vmatpush.msrb.mxu1 %v202_v52  ;;  %583 = vmatpush.msrb.mxu2 %v75_v53 }
  0x84   :  { %603 = vmatpush.msrb.mxu3 %v203_v54  ;;  %468 = vmatmul.f32.vlgmr.msra.gmra.mxu0 %v759_v0 }
  0x85   :  { %488 = vmatmul.f32.vlgmr.msra.gmra.mxu1 %v764_v1  ;;  %508 = vmatmul.f32.vlgmr.msra.gmra.mxu2 %v759_v0 }
  0x86   :  { %528 = vmatmul.f32.vlgmr.msra.gmra.mxu3 %v764_v1  ;;  %544 = vmatpush.msrb.mxu0 %v66_v55 }
  0x87   :  { %564 = vmatpush.msrb.mxu1 %v194_v56  ;;  %584 = vmatpush.msrb.mxu2 %v67_v57 }
  0x88   :  { %604 = vmatpush.msrb.mxu3 %v195_v58  ;;  %545 = vmatpush.msrb.mxu0 %v58_v59 }
  0x89   :  { %565 = vmatpush.msrb.mxu1 %v186_v60  ;;  %585 = vmatpush.msrb.mxu2 %v59_v61 }
  0x8a   :  { %605 = vmatpush.msrb.mxu3 %v187_v62  ;;  %546 = vmatpush.msrb.mxu0 %v50_v63 }
  0x8b   :  { %566 = vmatpush.msrb.mxu1 %v178_v2  ;;  %586 = vmatpush.msrb.mxu2 %v51_v3 }
  0x8c   :  { %606 = vmatpush.msrb.mxu3 %v179_v4  ;;  %547 = vmatpush.msrb.mxu0 %v42_v5 }
  0x8d   :  { %567 = vmatpush.msrb.mxu1 %v170_v6  ;;  %587 = vmatpush.msrb.mxu2 %v43_v7 }
  0x8e   :  { %607 = vmatpush.msrb.mxu3 %v171_v8  ;;  %548 = vmatmul.f32.vlgmr.msrb.gmra.mxu0 %v759_v0 }
  0x8f   :  { %568 = vmatmul.f32.vlgmr.msrb.gmra.mxu1 %v764_v1  ;;  %588 = vmatmul.f32.vlgmr.msrb.gmra.mxu2 %v759_v0 }
  0x90   :  { %608 = vmatmul.f32.vlgmr.msrb.gmra.mxu3 %v764_v1 }
  0xc4   :  { %v309_v9 = vpop.f32.mrf.mxu0  ;;  %v329_v10 = vpop.f32.mrf.mxu1 }
  0xc5   :  { %v330_v12 = vadd.f32 %v329_v10, %v309_v9 }
  0xc9   :  { %v616_v11 = vpop.permute.xlu0 %615 }
  0xca   :  { %v618_v16 = vmul.f32 %v616_v11, %v330_v12 }
  0xcb   :  { %v349_v13 = vpop.f32.mrf.mxu2  ;;  %v369_v14 = vpop.f32.mrf.mxu3 }
  0xcc   :  { %v370_v15 = vadd.f32 %v369_v14, %v349_v13 }
  0xce   :  { %v619_v17 = vmul.f32 %v616_v11, %v370_v15 }
  0xd2   :  { %v630_v18 = vpop.permute.xlu0 %629 }
  0xd3   :  { %v632_v19 = vadd.f32 %v630_v18, %v618_v16  ;;  %v633_v20 = vadd.f32 %v630_v18, %v619_v17 }
  0xd5   :  { %640 = vst [vmem:[#allocation5] sm:$0xff] %v632_v19 }
  0xd6   :  { %641 = vst [vmem:[#allocation5 + $0x8] sm:$0xff] %v633_v20 }
  0xe7   :  { %v389_v21 = vpop.f32.mrf.mxu0 }
  0xe8   :  { %v409_v22 = vpop.f32.mrf.mxu1 }
  0xe9   :  { %v410_v23 = vadd.f32 %v409_v22, %v389_v21 }
  0xeb   :  { %v620_v0 = vmul.f32 %v616_v11, %v410_v23 }
  0xed   :  { %v634_v24 = vadd.f32 %v630_v18, %v620_v0 }
  0xee   :  { %v429_v1 = vpop.f32.mrf.mxu2 }
  0xef   :  { %642 = vst [vmem:[#allocation5 + $0x10] sm:$0xff] %v634_v24  ;;  %v449_v25 = vpop.f32.mrf.mxu3 }
  0xf0   :  { %v450_v26 = vadd.f32 %v449_v25, %v429_v1 }
  0xf2   :  { %v621_v27 = vmul.f32 %v616_v11, %v450_v26 }
  0xf4   :  { %v635_v28 = vadd.f32 %v630_v18, %v621_v27 }
  0xf6   :  { %643 = vst [vmem:[#allocation5 + $0x18] sm:$0xff] %v635_v28 }
 0x101   :  { %v469_v29 = vpop.f32.mrf.mxu0 }
 0x102   :  { %v489_v30 = vpop.f32.mrf.mxu1 }
 0x103   :  { %v490_v31 = vadd.f32 %v489_v30, %v469_v29 }
 0x105   :  { %v622_v32 = vmul.f32 %v616_v11, %v490_v31 }
 0x107   :  { %v636_v33 = vadd.f32 %v630_v18, %v622_v32 }
 0x108   :  { %v509_v34 = vpop.f32.mrf.mxu2 }
 0x109   :  { %644 = vst [vmem:[#allocation5 + $0x20] sm:$0xff] %v636_v33  ;;  %v529_v35 = vpop.f32.mrf.mxu3 }
 0x10a   :  { %v530_v36 = vadd.f32 %v529_v35, %v509_v34 }
 0x10b   :  { %v549_v37 = vpop.f32.mrf.mxu0 }
 0x10c   :  { %v623_v38 = vmul.f32 %v616_v11, %v530_v36  ;;  %v569_v39 = vpop.f32.mrf.mxu1 }
 0x10d   :  { %v570_v40 = vadd.f32 %v569_v39, %v549_v37 }
 0x10e   :  { %v637_v41 = vadd.f32 %v630_v18, %v623_v38 }
 0x10f   :  { %v624_v42 = vmul.f32 %v616_v11, %v570_v40 }
 0x110   :  { %645 = vst [vmem:[#allocation5 + $0x28] sm:$0xff] %v637_v41 }
 0x111   :  { %v638_v43 = vadd.f32 %v630_v18, %v624_v42 }
 0x112   :  { %v589_v44 = vpop.f32.mrf.mxu2 }
 0x113   :  { %646 = vst [vmem:[#allocation5 + $0x30] sm:$0xff] %v638_v43  ;;  %v609_v45 = vpop.f32.mrf.mxu3 }
 0x114   :  { %v610_v46 = vadd.f32 %v609_v45, %v589_v44 }
 0x116   :  { %v625_v47 = vmul.f32 %v616_v11, %v610_v46 }
 0x118   :  { %v639_v48 = vadd.f32 %v630_v18, %v625_v47 }
 0x11a   :  { %647 = vst [vmem:[#allocation5 + $0x38] sm:$0xff] %v639_v48 }
 0x11b   :  { %658 = dma.vmem_to_hbm [thread:$0]  %s654_s27, 1024, %s656_s30, [#allocation4]  }
 0x11c   :  { %721 = dma.done.wait [#allocation4], 1024  }
 0x11d   :  { %722 = vsyncadd [#allocation4], 4294966272 }
 0x11e   :  { %663 = vsyncpa [#allocation3], 1 }
 0x11f   :  { %664 = vsyncpa [#allocation4], 1 }

</bundles_post_ra>
